<compile_context>
chip_gen: v7x
topology: tpu7x:2x2x1
jax: 0.10.0
libtpu: 0.0.40
codegen_flags: <defaults>
</compile_context>

<pallas_src>
import functools

import jax
import jax.numpy as jnp
from jax.experimental import pallas as pl
from jax.experimental.pallas import tpu as pltpu


def _smt_kernel(s_ref, w1_ref, b1_ref, w2_ref, b2_ref, w3_ref, b3_ref,
                g_ref, beta_ref, o_ref, *, eps):
    """One row-tile of the StructureModuleTransition forward.

    s_ref   : (TM, C)  input rows (native dtype)
    w*_ref  : (C, C)   linear weights, pre-transposed to [in, out]
    b*_ref  : (1, C)   linear biases
    g_ref   : (1, C)   LayerNorm weight (gamma)
    beta_ref: (1, C)   LayerNorm bias (beta)
    o_ref   : (TM, C)  output rows
    """
    s_in = s_ref[...]                                    # native dtype -> MXU

    # linear_1 + relu
    x = jnp.dot(s_in, w1_ref[...], preferred_element_type=jnp.float32)
    x = jnp.maximum(x + b1_ref[...].astype(jnp.float32), 0.0)

    # linear_2 + relu  (activation back to weight dtype for the MXU)
    x = jnp.dot(x.astype(w2_ref.dtype), w2_ref[...],
                preferred_element_type=jnp.float32)
    x = jnp.maximum(x + b2_ref[...].astype(jnp.float32), 0.0)

    # linear_3
    x = jnp.dot(x.astype(w3_ref.dtype), w3_ref[...],
                preferred_element_type=jnp.float32)
    x = x + b3_ref[...].astype(jnp.float32)

    # residual add (f32)
    x = x + s_in.astype(jnp.float32)

    # LayerNorm over the channel (lane) dimension, f32 math
    mean = jnp.mean(x, axis=-1, keepdims=True)
    centered = x - mean
    var = jnp.mean(centered * centered, axis=-1, keepdims=True)
    inv = jax.lax.rsqrt(var + eps)
    y = centered * inv * g_ref[...].astype(jnp.float32) \
        + beta_ref[...].astype(jnp.float32)

    o_ref[...] = y.astype(o_ref.dtype)


@functools.partial(jax.jit, static_argnames=("tm", "eps"))
def structure_module_transition(s, w1, b1, w2, b2, w3, b3, ln_w, ln_b,
                                *, tm=512, eps=1e-5):
    """Pallas implementation of StructureModuleTransition.forward.

    s          : (..., C)  input activations
    w1, w2, w3 : (C, C)    linear_{1,2,3}.weight, PyTorch convention [out, in]
    b1, b2, b3 : (C,)      linear_{1,2,3}.bias
    ln_w, ln_b : (C,)      LayerNorm weight / bias
    tm         : row tile (sweep 512-2048 for large N).  Per-step VMEM is
                 ~4 * tm * C * itemsize (double-buffered in/out blocks) plus
                 3 resident C*C weights.
    """
    orig_shape = s.shape
    c = orig_shape[-1]
    s2d = s.reshape(-1, c)
    n = s2d.shape[0]

    # Row tile: a multiple of 8 (sublane), or the full row count when small.
    # No wrapper-side padding; the partial last block is masked by Pallas and
    # rows are independent, so out-of-bounds rows never contaminate real ones.
    if n <= tm:
        tm_eff = n                       # block == full array dim: always legal
    else:
        tm_eff = max(8, (tm // 8) * 8)
    grid = (pl.cdiv(n, tm_eff),)

    # Pre-transpose weights to [in, out]; biases / LN params as (1, C) slabs.
    w1_t, w2_t, w3_t = w1.T, w2.T, w3.T
    b1_2d, b2_2d, b3_2d = b1.reshape(1, c), b2.reshape(1, c), b3.reshape(1, c)
    g_2d, beta_2d = ln_w.reshape(1, c), ln_b.reshape(1, c)

    kernel = functools.partial(_smt_kernel, eps=eps)

    out = pl.pallas_call(
        kernel,
        out_shape=jax.ShapeDtypeStruct((n, c), s.dtype),
        grid_spec=pltpu.PrefetchScalarGridSpec(
            num_scalar_prefetch=0,
            grid=grid,
            in_specs=[
                pl.BlockSpec((tm_eff, c), lambda i: (i, 0)),  # activations
                pl.BlockSpec((c, c), lambda i: (0, 0)),       # w1 (resident)
                pl.BlockSpec((1, c), lambda i: (0, 0)),       # b1
                pl.BlockSpec((c, c), lambda i: (0, 0)),       # w2
                pl.BlockSpec((1, c), lambda i: (0, 0)),       # b2
                pl.BlockSpec((c, c), lambda i: (0, 0)),       # w3
                pl.BlockSpec((1, c), lambda i: (0, 0)),       # b3
                pl.BlockSpec((1, c), lambda i: (0, 0)),       # ln weight
                pl.BlockSpec((1, c), lambda i: (0, 0)),       # ln bias
            ],
            out_specs=pl.BlockSpec((tm_eff, c), lambda i: (i, 0)),
        ),
        compiler_params=pltpu.CompilerParams(
            dimension_semantics=("parallel",),
            vmem_limit_bytes=64 << 20,
        ),
    )(s2d, w1_t, b1_2d, w2_t, b2_2d, w3_t, b3_2d, g_2d, beta_2d)

    return out.reshape(orig_shape)


def _reference(s, w1, b1, w2, b2, w3, b3, ln_w, ln_b, eps=1e-5):
    """Pure-JAX reference matching the PyTorch forward."""
    x = s @ w1.T + b1
    x = jnp.maximum(x, 0.0)
    x = x @ w2.T + b2
    x = jnp.maximum(x, 0.0)
    x = x @ w3.T + b3
    x = x + s
    mean = jnp.mean(x, axis=-1, keepdims=True)
    var = jnp.mean((x - mean) ** 2, axis=-1, keepdims=True)
    return (x - mean) / jnp.sqrt(var + eps) * ln_w + ln_b


if __name__ == "__main__":
    key = jax.random.PRNGKey(0)
    keys = jax.random.split(key, 9)

    # Small shapes consistent with the module: (batch, seq, c), lane-dense C.
    batch, seq, c = 2, 16, 128
    dtype = jnp.float32

    s = jax.random.normal(keys[0], (batch, seq, c), dtype=dtype)

    # linear_1 / linear_2: init='relu' -> He (fan_in, scale=2) trunc normal;
    # synthetic equivalent: normal with std = sqrt(2 / fan_in).
    he = jnp.sqrt(2.0 / c)
    w1 = jax.random.normal(keys[1], (c, c), dtype=dtype) * he
    w2 = jax.random.normal(keys[2], (c, c), dtype=dtype) * he
    # linear_3: init='final' is zeros; use small random values so the third
    # matmul path is actually exercised by the correctness check.
    w3 = jax.random.normal(keys[3], (c, c), dtype=dtype) * 0.02
    b1 = jax.random.normal(keys[4], (c,), dtype=dtype) * 0.1
    b2 = jax.random.normal(keys[5], (c,), dtype=dtype) * 0.1
    b3 = jax.random.normal(keys[6], (c,), dtype=dtype) * 0.1
    # LayerNorm params (defaults are weight=1, bias=0; perturb for the test).
    ln_w = 1.0 + 0.1 * jax.random.normal(keys[7], (c,), dtype=dtype)
    ln_b = 0.1 * jax.random.normal(keys[8], (c,), dtype=dtype)

    out = structure_module_transition(s, w1, b1, w2, b2, w3, b3, ln_w, ln_b)
    out = jax.block_until_ready(out)

    ref = _reference(s, w1, b1, w2, b2, w3, b3, ln_w, ln_b)
    assert out.shape == s.shape
    assert jnp.allclose(out, ref, atol=2e-5, rtol=2e-5), "mismatch vs reference"

    print("KERNEL_OK")
</pallas_src>

<mosaic_0001>
module attributes {stable_mosaic.version = 11 : i64} {
  func.func @_smt_kernel(%arg0: i32, %arg1: memref<32x128xf32, #tpu.memory_space<vmem>>, %arg2: memref<128x128xf32, #tpu.memory_space<vmem>>, %arg3: memref<1x128xf32, #tpu.memory_space<vmem>>, %arg4: memref<128x128xf32, #tpu.memory_space<vmem>>, %arg5: memref<1x128xf32, #tpu.memory_space<vmem>>, %arg6: memref<128x128xf32, #tpu.memory_space<vmem>>, %arg7: memref<1x128xf32, #tpu.memory_space<vmem>>, %arg8: memref<1x128xf32, #tpu.memory_space<vmem>>, %arg9: memref<1x128xf32, #tpu.memory_space<vmem>>, %arg10: memref<32x128xf32, #tpu.memory_space<vmem>>) attributes {dimension_semantics = [#tpu.dimension_semantics<parallel>], iteration_bounds = array<i64: 1>, scalar_prefetch = 0 : i64, scratch_operands = 0 : i64, tpu.core_type = #tpu.core_type<tc>, window_params = [{transform_indices = @transform_0, window_bounds = array<i64: 32, 128>}, {pipeline_mode = #tpu.pipeline_mode<synchronous>, transform_indices = @transform_1, window_bounds = array<i64: 128, 128>}, {pipeline_mode = #tpu.pipeline_mode<synchronous>, transform_indices = @transform_2, window_bounds = array<i64: 1, 128>}, {pipeline_mode = #tpu.pipeline_mode<synchronous>, transform_indices = @transform_3, window_bounds = array<i64: 128, 128>}, {pipeline_mode = #tpu.pipeline_mode<synchronous>, transform_indices = @transform_4, window_bounds = array<i64: 1, 128>}, {pipeline_mode = #tpu.pipeline_mode<synchronous>, transform_indices = @transform_5, window_bounds = array<i64: 128, 128>}, {pipeline_mode = #tpu.pipeline_mode<synchronous>, transform_indices = @transform_6, window_bounds = array<i64: 1, 128>}, {pipeline_mode = #tpu.pipeline_mode<synchronous>, transform_indices = @transform_7, window_bounds = array<i64: 1, 128>}, {pipeline_mode = #tpu.pipeline_mode<synchronous>, transform_indices = @transform_8, window_bounds = array<i64: 1, 128>}, {transform_indices = @transform_9, window_bounds = array<i64: 32, 128>}]} {
    %c0 = arith.constant 0 : index
    %c0_0 = arith.constant 0 : index
    %0 = vector.load %arg1[%c0, %c0_0] : memref<32x128xf32, #tpu.memory_space<vmem>>, vector<32x128xf32>
    %c0_1 = arith.constant 0 : index
    %c0_2 = arith.constant 0 : index
    %1 = vector.load %arg2[%c0_1, %c0_2] : memref<128x128xf32, #tpu.memory_space<vmem>>, vector<128x128xf32>
    %cst = arith.constant dense<0.000000e+00> : vector<32x128xf32>
    %2 = tpu.matmul %0, %1, %cst {dimension_numbers = #tpu.dot_dimension_numbers<[1], [0], [0], [1], [0, 0, 1, 1], [], []>} : vector<32x128xf32>, vector<128x128xf32>, vector<32x128xf32> -> vector<32x128xf32>
    %c0_3 = arith.constant 0 : index
    %c0_4 = arith.constant 0 : index
    %3 = vector.load %arg3[%c0_3, %c0_4] : memref<1x128xf32, #tpu.memory_space<vmem>>, vector<1x128xf32>
    %4 = vector.broadcast %3 : vector<1x128xf32> to vector<32x128xf32>
    %5 = arith.addf %2, %4 : vector<32x128xf32>
    %cst_5 = arith.constant 0.000000e+00 : f32
    %6 = vector.broadcast %cst_5 : f32 to vector<32x128xf32>
    %7 = arith.maximumf %5, %6 : vector<32x128xf32>
    %c0_6 = arith.constant 0 : index
    %c0_7 = arith.constant 0 : index
    %8 = vector.load %arg4[%c0_6, %c0_7] : memref<128x128xf32, #tpu.memory_space<vmem>>, vector<128x128xf32>
    %cst_8 = arith.constant dense<0.000000e+00> : vector<32x128xf32>
    %9 = tpu.matmul %7, %8, %cst_8 {dimension_numbers = #tpu.dot_dimension_numbers<[1], [0], [0], [1], [0, 0, 1, 1], [], []>} : vector<32x128xf32>, vector<128x128xf32>, vector<32x128xf32> -> vector<32x128xf32>
    %c0_9 = arith.constant 0 : index
    %c0_10 = arith.constant 0 : index
    %10 = vector.load %arg5[%c0_9, %c0_10] : memref<1x128xf32, #tpu.memory_space<vmem>>, vector<1x128xf32>
    %11 = vector.broadcast %10 : vector<1x128xf32> to vector<32x128xf32>
    %12 = arith.addf %9, %11 : vector<32x128xf32>
    %cst_11 = arith.constant 0.000000e+00 : f32
    %13 = vector.broadcast %cst_11 : f32 to vector<32x128xf32>
    %14 = arith.maximumf %12, %13 : vector<32x128xf32>
    %c0_12 = arith.constant 0 : index
    %c0_13 = arith.constant 0 : index
    %15 = vector.load %arg6[%c0_12, %c0_13] : memref<128x128xf32, #tpu.memory_space<vmem>>, vector<128x128xf32>
    %cst_14 = arith.constant dense<0.000000e+00> : vector<32x128xf32>
    %16 = tpu.matmul %14, %15, %cst_14 {dimension_numbers = #tpu.dot_dimension_numbers<[1], [0], [0], [1], [0, 0, 1, 1], [], []>} : vector<32x128xf32>, vector<128x128xf32>, vector<32x128xf32> -> vector<32x128xf32>
    %c0_15 = arith.constant 0 : index
    %c0_16 = arith.constant 0 : index
    %17 = vector.load %arg7[%c0_15, %c0_16] : memref<1x128xf32, #tpu.memory_space<vmem>>, vector<1x128xf32>
    %18 = vector.broadcast %17 : vector<1x128xf32> to vector<32x128xf32>
    %19 = arith.addf %16, %18 : vector<32x128xf32>
    %20 = arith.addf %19, %0 : vector<32x128xf32>
    %cst_17 = arith.constant dense<0.000000e+00> : vector<32xf32>
    %21 = vector.multi_reduction <add>, %20, %cst_17 [1] : vector<32x128xf32> to vector<32xf32>
    %22 = vector.shape_cast %21 : vector<32xf32> to vector<32x1xf32>
    %cst_18 = arith.constant 1.280000e+02 : f32
    %23 = vector.broadcast %cst_18 : f32 to vector<32x1xf32>
    %24 = arith.divf %22, %23 : vector<32x1xf32>
    %25 = vector.broadcast %24 : vector<32x1xf32> to vector<32x128xf32>
    %26 = arith.subf %20, %25 : vector<32x128xf32>
    %27 = arith.mulf %26, %26 : vector<32x128xf32>
    %cst_19 = arith.constant dense<0.000000e+00> : vector<32xf32>
    %28 = vector.multi_reduction <add>, %27, %cst_19 [1] : vector<32x128xf32> to vector<32xf32>
    %29 = vector.shape_cast %28 : vector<32xf32> to vector<32x1xf32>
    %cst_20 = arith.constant 1.280000e+02 : f32
    %30 = vector.broadcast %cst_20 : f32 to vector<32x1xf32>
    %31 = arith.divf %29, %30 : vector<32x1xf32>
    %cst_21 = arith.constant 9.99999974E-6 : f32
    %32 = vector.broadcast %cst_21 : f32 to vector<32x1xf32>
    %33 = arith.addf %31, %32 : vector<32x1xf32>
    %34 = math.rsqrt %33 : vector<32x1xf32>
    %35 = vector.broadcast %34 : vector<32x1xf32> to vector<32x128xf32>
    %36 = arith.mulf %26, %35 : vector<32x128xf32>
    %c0_22 = arith.constant 0 : index
    %c0_23 = arith.constant 0 : index
    %37 = vector.load %arg8[%c0_22, %c0_23] : memref<1x128xf32, #tpu.memory_space<vmem>>, vector<1x128xf32>
    %38 = vector.broadcast %37 : vector<1x128xf32> to vector<32x128xf32>
    %39 = arith.mulf %36, %38 : vector<32x128xf32>
    %c0_24 = arith.constant 0 : index
    %c0_25 = arith.constant 0 : index
    %40 = vector.load %arg9[%c0_24, %c0_25] : memref<1x128xf32, #tpu.memory_space<vmem>>, vector<1x128xf32>
    %41 = vector.broadcast %40 : vector<1x128xf32> to vector<32x128xf32>
    %42 = arith.addf %39, %41 : vector<32x128xf32>
    %c0_26 = arith.constant 0 : index
    %c0_27 = arith.constant 0 : index
    %43 = vector.load %arg10[%c0_26, %c0_27] : memref<32x128xf32, #tpu.memory_space<vmem>>, vector<32x128xf32>
    tpu.vector_store %arg10[%c0_26, %c0_27], %42 {strides = array<i32>} : memref<32x128xf32, #tpu.memory_space<vmem>>, vector<32x128xf32>,
    return
  }
  func.func @transform_0(%arg0: i32) -> (i32, i32) {
    %c0_i32 = arith.constant 0 : i32
    %c0_i32_0 = arith.constant 0 : i32
    return %arg0, %c0_i32 : i32, i32
  }
  func.func @transform_1(%arg0: i32) -> (i32, i32) {
    %c0_i32 = arith.constant 0 : i32
    %c0_i32_0 = arith.constant 0 : i32
    %c0_i32_1 = arith.constant 0 : i32
    return %c0_i32, %c0_i32_0 : i32, i32
  }
  func.func @transform_2(%arg0: i32) -> (i32, i32) {
    %c0_i32 = arith.constant 0 : i32
    %c0_i32_0 = arith.constant 0 : i32
    %c0_i32_1 = arith.constant 0 : i32
    return %c0_i32, %c0_i32_0 : i32, i32
  }
  func.func @transform_3(%arg0: i32) -> (i32, i32) {
    %c0_i32 = arith.constant 0 : i32
    %c0_i32_0 = arith.constant 0 : i32
    %c0_i32_1 = arith.constant 0 : i32
    return %c0_i32, %c0_i32_0 : i32, i32
  }
  func.func @transform_4(%arg0: i32) -> (i32, i32) {
    %c0_i32 = arith.constant 0 : i32
    %c0_i32_0 = arith.constant 0 : i32
    %c0_i32_1 = arith.constant 0 : i32
    return %c0_i32, %c0_i32_0 : i32, i32
  }
  func.func @transform_5(%arg0: i32) -> (i32, i32) {
    %c0_i32 = arith.constant 0 : i32
    %c0_i32_0 = arith.constant 0 : i32
    %c0_i32_1 = arith.constant 0 : i32
    return %c0_i32, %c0_i32_0 : i32, i32
  }
  func.func @transform_6(%arg0: i32) -> (i32, i32) {
    %c0_i32 = arith.constant 0 : i32
    %c0_i32_0 = arith.constant 0 : i32
    %c0_i32_1 = arith.constant 0 : i32
    return %c0_i32, %c0_i32_0 : i32, i32
  }
  func.func @transform_7(%arg0: i32) -> (i32, i32) {
    %c0_i32 = arith.constant 0 : i32
    %c0_i32_0 = arith.constant 0 : i32
    %c0_i32_1 = arith.constant 0 : i32
    return %c0_i32, %c0_i32_0 : i32, i32
  }
  func.func @transform_8(%arg0: i32) -> (i32, i32) {
    %c0_i32 = arith.constant 0 : i32
    %c0_i32_0 = arith.constant 0 : i32
    %c0_i32_1 = arith.constant 0 : i32
    return %c0_i32, %c0_i32_0 : i32, i32
  }
  func.func @transform_9(%arg0: i32) -> (i32, i32) {
    %c0_i32 = arith.constant 0 : i32
    %c0_i32_0 = arith.constant 0 : i32
    return %arg0, %c0_i32 : i32, i32
  }
}

</mosaic_0001>

<bundles_post_ra>
// kernel: structure_module_transition.1
= control target key start
LH: loop header
LB: loop body
LE: loop exit
PB: predicated region body
PF: predicated region fallthrough
CT: control target
= control target key end

     0   :  { %14 = vsyncpa [#allocation3], 0  ;;  %s1340_s0 = inlined_call_operand.hbm [shape: f32[32,128], index: 0, kind: input, shape index: {}]   ;;  %s1341_s1 = inlined_call_operand.hbm [shape: f32[128,128], index: 1, kind: input, shape index: {}]   ;;  %s1342_s2 = inlined_call_operand.hbm [shape: f32[1,128], index: 2, kind: input, shape index: {}]   ;;  %s1343_s3 = inlined_call_operand.hbm [shape: f32[128,128], index: 3, kind: input, shape index: {}]   ;;  %s1344_s4 = inlined_call_operand.hbm [shape: f32[1,128], index: 4, kind: input, shape index: {}]   ;;  %s1345_s5 = inlined_call_operand.hbm [shape: f32[128,128], index: 5, kind: input, shape index: {}]   ;;  %s1346_s6 = inlined_call_operand.hbm [shape: f32[1,128], index: 6, kind: input, shape index: {}]   ;;  %s1347_s7 = inlined_call_operand.hbm [shape: f32[1,128], index: 7, kind: input, shape index: {}]   ;;  %s1348_s8 = inlined_call_operand.hbm [shape: f32[1,128], index: 8, kind: input, shape index: {}]   ;;  %s1349_s9 = inlined_call_operand.hbm [shape: f32[32,128], index: 9, kind: output, shape index: {}]  }
   0x1   :  { %15 = vsyncpa [#allocation6], 0 }
   0x2   :  { %16 = vsyncpa [#allocation9], 0 }
   0x3   :  { %17 = vsyncpa [#allocation12], 0 }
   0x4   :  { %18 = vsyncpa [#allocation15], 0 }
   0x5   :  { %19 = vsyncpa [#allocation4], 0  ;;  %s1120_s30 = smov [#allocation5]   ;;  %s1121_s11 = smov [#allocation8]  }
   0x6   :  { %s37_s10 = sshll.u32 %s1120_s30, 4  ;;  %s59_s12 = sshll.u32 %s1121_s11, 4  ;;  %s38_s10 = int_to_ptr.vmem [resolvable:$true] %s37_s10  ;;  %s1182_s12 = int_to_ptr.vmem [resolvable:$true] %s59_s12 }
   0x7   :  { %s888_s15 = scalar_lea.hbm %s1341_s1, 2048 }
   0x8   :  { %p889_p0 = scmp.ne.s32.totalorder %s1341_s1, %s888_s15  ;;  %p892_p1 = scmp.lt.u32.totalorder %s888_s15, %s1341_s1 }
   0xa   :  { %p894_p2 = pnand %p892_p1, %p889_p0 }
   0xc   :  { %897 = shalt.err (!%p894_p2)
}
   0xd   :  { %s898_s20 = scalar_lea.vmem %s38_s10, 2048  ;;  %p903_p4 = scmp.lt.s32.totalorder %s38_s10, %s38_s10 }
   0xe   :  { %p899_p3 = scmp.ne.s32.totalorder %s38_s10, %s898_s20  ;;  %p904_p5 = scmp.lt.s32.totalorder %s898_s20, %s898_s20 }
  0x10   :  { %p905_p6 = por %p904_p5, %p903_p4 }
  0x12   :  { %p906_p7 = pnand %p905_p6, %p899_p3 }
  0x14   :  { %909 = shalt.err (!%p906_p7)
}
  0x15   :  { %s1122_s21 = smov 128   ;;  %s1123_s22 = smov 8  }
  0x16   :  { %43 = dma.hbm_to_vmem [thread:$0]  %s1341_s1, 2048, %s38_s10, [#allocation6], %s1122_s21, %s1122_s21, %s1123_s22  }
  0x17   :  { %s910_s27 = scalar_lea.hbm %s1343_s3, 2048 }
  0x18   :  { %p911_p8 = scmp.ne.s32.totalorder %s1343_s3, %s910_s27  ;;  %p914_p9 = scmp.lt.u32.totalorder %s910_s27, %s1343_s3 }
  0x1a   :  { %p916_p10 = pnand %p914_p9, %p911_p8 }
  0x1c   :  { %919 = shalt.err (!%p916_p10)
}
  0x1d   :  { %s920_s13 = scalar_lea.vmem %s1182_s12, 2048  ;;  %p925_p12 = scmp.lt.s32.totalorder %s1182_s12, %s1182_s12 }
  0x1e   :  { %p921_p11 = scmp.ne.s32.totalorder %s1182_s12, %s920_s13  ;;  %p926_p13 = scmp.lt.s32.totalorder %s920_s13, %s920_s13 }
  0x20   :  { %p927_p0 = por %p926_p13, %p925_p12 }
  0x22   :  { %p928_p1 = pnand %p927_p0, %p921_p11 }
  0x24   :  { %931 = shalt.err (!%p928_p1)
}
  0x25   :  { %65 = dma.hbm_to_vmem [thread:$0]  %s1343_s3, 2048, %s1182_s12, [#allocation9], %s1122_s21, %s1122_s21, %s1123_s22  }
  0x26   :  { %s1124_s14 = smov [#allocation11]   ;;  %s1125_s16 = smov [#allocation14]  }
  0x27   :  { %s81_s15 = sshll.u32 %s1124_s14, 4  ;;  %s104_s17 = sshll.u32 %s1125_s16, 4  ;;  %s82_s15 = int_to_ptr.vmem [resolvable:$true] %s81_s15  ;;  %s105_s17 = int_to_ptr.vmem [resolvable:$true] %s104_s17 }
  0x28   :  { %s932_s20 = scalar_lea.hbm %s1345_s5, 2048 }
  0x29   :  { %p933_p2 = scmp.ne.s32.totalorder %s1345_s5, %s932_s20  ;;  %p936_p3 = scmp.lt.u32.totalorder %s932_s20, %s1345_s5 }
  0x2b   :  { %p938_p4 = pnand %p936_p3, %p933_p2 }
  0x2d   :  { %941 = shalt.err (!%p938_p4)
}
  0x2e   :  { %s942_s3 = scalar_lea.vmem %s82_s15, 2048  ;;  %p947_p6 = scmp.lt.s32.totalorder %s82_s15, %s82_s15 }
  0x2f   :  { %p943_p5 = scmp.ne.s32.totalorder %s82_s15, %s942_s3  ;;  %p948_p7 = scmp.lt.s32.totalorder %s942_s3, %s942_s3 }
  0x31   :  { %p949_p8 = por %p948_p7, %p947_p6 }
  0x33   :  { %p950_p9 = pnand %p949_p8, %p943_p5 }
  0x35   :  { %953 = shalt.err (!%p950_p9)
}
  0x36   :  { %87 = dma.hbm_to_vmem [thread:$0]  %s1345_s5, 2048, %s82_s15, [#allocation12], %s1122_s21, %s1122_s21, %s1123_s22  }
  0x37   :  { %s954_s30 = scalar_lea.hbm %s1347_s7, 16 }
  0x38   :  { %p955_p10 = scmp.ne.s32.totalorder %s1347_s7, %s954_s30  ;;  %p958_p11 = scmp.lt.u32.totalorder %s954_s30, %s1347_s7 }
  0x3a   :  { %p960_p12 = pnand %p958_p11, %p955_p10 }
  0x3c   :  { %963 = shalt.err (!%p960_p12)
}
  0x3d   :  { %s964_s14 = scalar_lea.vmem %s105_s17, 16  ;;  %s968_s16 = scalar_lea.vmem %s105_s17, 32 }
  0x3e   :  { %p965_p13 = scmp.ne.s32.totalorder %s105_s17, %s964_s14  ;;  %p969_p0 = scmp.lt.s32.totalorder %s105_s17, %s105_s17 }
  0x3f   :  { %p970_p1 = scmp.lt.s32.totalorder %s968_s16, %s964_s14 }
  0x41   :  { %p971_p2 = por %p970_p1, %p969_p0 }
  0x43   :  { %p972_p3 = pnand %p971_p2, %p965_p13 }
  0x45   :  { %975 = shalt.err (!%p972_p3)
}
  0x46   :  { %107 = dma.hbm_to_vmem [thread:$0]  %s1347_s7, 16, %s105_s17, [#allocation15]  }
  0x47   :  { %s1126_s18 = smov [#allocation2]   ;;  %s1127_s20 = smov [#allocation7]  }
  0x48   :  { %s25_s19 = sshll.u32 %s1126_s18, 4  ;;  %s50_s23 = sshll.u32 %s1127_s20, 4  ;;  %s26_s19 = int_to_ptr.vmem [resolvable:$true] %s25_s19  ;;  %s51_s23 = int_to_ptr.vmem [resolvable:$true] %s50_s23 }
  0x49   :  { %s976_s26 = scalar_lea.hbm %s1340_s0, 512 }
  0x4a   :  { %p977_p4 = scmp.ne.s32.totalorder %s1340_s0, %s976_s26  ;;  %p980_p5 = scmp.lt.u32.totalorder %s976_s26, %s1340_s0 }
  0x4c   :  { %p982_p6 = pnand %p980_p5, %p977_p4 }
  0x4e   :  { %985 = shalt.err (!%p982_p6)
}
  0x4f   :  { %s986_s7 = scalar_lea.vmem %s26_s19, 512  ;;  %p991_p8 = scmp.lt.s32.totalorder %s26_s19, %s26_s19 }
  0x50   :  { %p987_p7 = scmp.ne.s32.totalorder %s26_s19, %s986_s7  ;;  %p992_p9 = scmp.lt.s32.totalorder %s986_s7, %s986_s7 }
  0x52   :  { %p993_p10 = por %p992_p9, %p991_p8 }
  0x54   :  { %p994_p11 = pnand %p993_p10, %p987_p7 }
  0x56   :  { %997 = shalt.err (!%p994_p11)
}
  0x57   :  { %31 = dma.hbm_to_vmem [thread:$0]  %s1340_s0, 512, %s26_s19, [#allocation3], %s1122_s21, %s1122_s21, %s1123_s22  }
  0x58   :  { %s998_s13 = scalar_lea.hbm %s1342_s2, 16 }
  0x59   :  { %p999_p12 = scmp.ne.s32.totalorder %s1342_s2, %s998_s13  ;;  %p1002_p13 = scmp.lt.u32.totalorder %s998_s13, %s1342_s2 }
  0x5b   :  { %p1004_p0 = pnand %p1002_p13, %p999_p12 }
  0x5d   :  { %1007 = shalt.err (!%p1004_p0)
}
  0x5e   :  { %s1008_s5 = scalar_lea.vmem %s51_s23, 16  ;;  %s1012_s15 = scalar_lea.vmem %s51_s23, 32 }
  0x5f   :  { %p1009_p1 = scmp.ne.s32.totalorder %s51_s23, %s1008_s5  ;;  %p1013_p2 = scmp.lt.s32.totalorder %s51_s23, %s51_s23 }
  0x60   :  { %p1014_p3 = scmp.lt.s32.totalorder %s1012_s15, %s1008_s5 }
  0x62   :  { %p1015_p4 = por %p1014_p3, %p1013_p2 }
  0x64   :  { %p1016_p5 = pnand %p1015_p4, %p1009_p1 }
  0x66   :  { %1019 = shalt.err (!%p1016_p5)
}
  0x67   :  { %53 = dma.hbm_to_vmem [thread:$0]  %s1342_s2, 16, %s51_s23, [#allocation6]  }
  0x68   :  { %s1128_s19 = smov [#allocation10]   ;;  %s1129_s24 = smov [#allocation13]  }
  0x69   :  { %s72_s20 = sshll.u32 %s1128_s19, 4  ;;  %s94_s25 = sshll.u32 %s1129_s24, 4  ;;  %s73_s20 = int_to_ptr.vmem [resolvable:$true] %s72_s20  ;;  %s95_s25 = int_to_ptr.vmem [resolvable:$true] %s94_s25 }
  0x6a   :  { %s1020_s12 = scalar_lea.hbm %s1344_s4, 16 }
  0x6b   :  { %p1021_p6 = scmp.ne.s32.totalorder %s1344_s4, %s1020_s12  ;;  %p1024_p7 = scmp.lt.u32.totalorder %s1020_s12, %s1344_s4 }
  0x6d   :  { %p1026_p8 = pnand %p1024_p7, %p1021_p6 }
  0x6f   :  { %1029 = shalt.err (!%p1026_p8)
}
  0x70   :  { %s1030_s2 = scalar_lea.vmem %s73_s20, 16  ;;  %s1034_s23 = scalar_lea.vmem %s73_s20, 32 }
  0x71   :  { %p1031_p9 = scmp.ne.s32.totalorder %s73_s20, %s1030_s2  ;;  %p1035_p10 = scmp.lt.s32.totalorder %s73_s20, %s73_s20 }
  0x72   :  { %p1036_p11 = scmp.lt.s32.totalorder %s1034_s23, %s1030_s2 }
  0x74   :  { %p1037_p12 = por %p1036_p11, %p1035_p10 }
  0x76   :  { %p1038_p13 = pnand %p1037_p12, %p1031_p9 }
  0x78   :  { %1041 = shalt.err (!%p1038_p13)
}
  0x79   :  { %75 = dma.hbm_to_vmem [thread:$0]  %s1344_s4, 16, %s73_s20, [#allocation9]  }
  0x7a   :  { %s1042_s1 = scalar_lea.hbm %s1346_s6, 16 }
  0x7b   :  { %p1043_p0 = scmp.ne.s32.totalorder %s1346_s6, %s1042_s1  ;;  %p1046_p1 = scmp.lt.u32.totalorder %s1042_s1, %s1346_s6 }
  0x7d   :  { %p1048_p2 = pnand %p1046_p1, %p1043_p0 }
  0x7f   :  { %1051 = shalt.err (!%p1048_p2)
}
  0x80   :  { %s1052_s15 = scalar_lea.vmem %s95_s25, 16  ;;  %s1056_s0 = scalar_lea.vmem %s95_s25, 32 }
  0x81   :  { %p1053_p3 = scmp.ne.s32.totalorder %s95_s25, %s1052_s15  ;;  %p1057_p4 = scmp.lt.s32.totalorder %s95_s25, %s95_s25 }
  0x82   :  { %p1058_p5 = scmp.lt.s32.totalorder %s1056_s0, %s1052_s15 }
  0x84   :  { %p1059_p6 = por %p1058_p5, %p1057_p4 }
  0x86   :  { %p1060_p7 = pnand %p1059_p6, %p1053_p3 }
  0x88   :  { %1063 = shalt.err (!%p1060_p7)
}
  0x89   :  { %97 = dma.hbm_to_vmem [thread:$0]  %s1346_s6, 16, %s95_s25, [#allocation12]  }
  0x8a   :  { %s1130_s19 = smov [#allocation16]   ;;  %s1064_s3 = scalar_lea.hbm %s1348_s8, 16 }
  0x8b   :  { %s114_s20 = sshll.u32 %s1130_s19, 4  ;;  %p1065_p8 = scmp.ne.s32.totalorder %s1348_s8, %s1064_s3  ;;  %s115_s20 = int_to_ptr.vmem [resolvable:$true] %s114_s20 }
  0x8c   :  { %p1068_p9 = scmp.lt.u32.totalorder %s1064_s3, %s1348_s8 }
  0x8e   :  { %p1070_p10 = pnand %p1068_p9, %p1065_p8 }
  0x90   :  { %1073 = shalt.err (!%p1070_p10)
}
  0x91   :  { %s1074_s17 = scalar_lea.vmem %s115_s20, 16  ;;  %s1078_s6 = scalar_lea.vmem %s115_s20, 32 }
  0x92   :  { %p1075_p11 = scmp.ne.s32.totalorder %s115_s20, %s1074_s17  ;;  %p1079_p12 = scmp.lt.s32.totalorder %s115_s20, %s115_s20 }
  0x93   :  { %p1080_p13 = scmp.lt.s32.totalorder %s1078_s6, %s1074_s17 }
  0x95   :  { %p1081_p0 = por %p1080_p13, %p1079_p12 }
  0x97   :  { %p1082_p1 = pnand %p1081_p0, %p1075_p11 }
  0x99   :  { %1085 = shalt.err (!%p1082_p1)
}
  0x9a   :  { %117 = dma.hbm_to_vmem [thread:$0]  %s1348_s8, 16, %s115_s20, [#allocation15]  }
  0x9b   :  { %1108 = dma.done.wait [#allocation3], 512  }
  0x9c   :  { %1109 = vsyncadd [#allocation3], 4294966784 }
  0x9d   :  { %1110 = dma.done.wait [#allocation6], 2064  }
  0x9e   :  { %1111 = vsyncadd [#allocation6], 4294965232 }
  0x9f   :  { %1112 = dma.done.wait [#allocation9], 2064  }
  0xa0   :  { %1113 = vsyncadd [#allocation9], 4294965232 }
  0xa1   :  { %1114 = dma.done.wait [#allocation12], 2064  }
  0xa2   :  { %1115 = vsyncadd [#allocation12], 4294965232 }
  0xa3   :  { %1116 = dma.done.wait [#allocation15], 32  }
  0xa4   :  { %1117 = vsyncadd [#allocation15], 4294967264  ;;  %v149_v0 = vld [vmem:[#allocation5] sm:$0xff]  ;;  %v150_v1 = vld [vmem:[#allocation5 + $0x8] sm:$0xff]  ;;  %s1131_s8 = smov [#allocation17]  }
  0xa5   :  { %v151_v2 = vld [vmem:[#allocation5 + $0x10] sm:$0xff]  ;;  %v756_v3 = vpack.c.bf16 %v150_v1, %v149_v0  ;;  %v152_v4 = vld [vmem:[#allocation5 + $0x18] sm:$0xff]  ;;  %v153_v6 = vld [vmem:[#allocation5 + $0x20] sm:$0xff]  ;;  %s561_s23 = sshll.u32 %s1131_s8, 4  ;;  %s562_s23 = int_to_ptr.vmem [resolvable:$true] %s561_s23 }
  0xa6   :  { %v760_v5 = vpack.c.bf16 %v152_v4, %v151_v2  ;;  %v154_v7 = vld [vmem:[#allocation5 + $0x28] sm:$0xff]  ;;  %v1309_v9 = vld [vmem:[#allocation2] sm:$0xff]  ;;  %v155_v10 = vld [vmem:[#allocation5 + $0x30] sm:$0xff]  ;;  %s1086_s29 = scalar_lea.vmem %s562_s23, 512  ;;  %p1091_p3 = scmp.lt.s32.totalorder %s562_s23, %s562_s23 }
  0xa7   :  { %757 = vmatprep.subr.bf16.mxu0 %v756_v3  ;;  %v764_v8 = vpack.c.bf16 %v154_v7, %v153_v6  ;;  %v156_v11 = vld [vmem:[#allocation5 + $0x38] sm:$0xff]  ;;  %674 = vmatprep.mubr.f32.mxu0 %v1309_v9  ;;  %v261_v12 = vld [vmem:[#allocation8] sm:$0xff]  ;;  %v262_v13 = vld [vmem:[#allocation8 + $0x8] sm:$0xff]  ;;  %p1087_p2 = scmp.ne.s32.totalorder %s562_s23, %s1086_s29  ;;  %p1092_p4 = scmp.lt.s32.totalorder %s1086_s29, %s1086_s29 }
  0xa8   :  { %759 = vmatpush3.bf16.msra.mxu0 %v756_v3  ;;  %v263_v14 = vld [vmem:[#allocation8 + $0x10] sm:$0xff]  ;;  %v264_v15 = vld [vmem:[#allocation8 + $0x18] sm:$0xff]  ;;  %v788_v16 = vpack.c.bf16 %v262_v13, %v261_v12  ;;  %v768_v18 = vpack.c.bf16 %v156_v11, %v155_v10  ;;  %v265_v19 = vld [vmem:[#allocation8 + $0x20] sm:$0xff] }
  0xa9   :  { %761 = vmatprep.subr.bf16.mxu0 %v760_v5  ;;  %v792_v17 = vpack.c.bf16 %v264_v15, %v263_v14  ;;  %v266_v20 = vld [vmem:[#allocation8 + $0x28] sm:$0xff]  ;;  %v157_v21 = vld [vmem:[#allocation5 + $0x40] sm:$0xff]  ;;  %v267_v25 = vld [vmem:[#allocation8 + $0x30] sm:$0xff]  ;;  %p1093_p5 = por %p1092_p4, %p1091_p3 }
  0xaa   :  { %v158_v22 = vld [vmem:[#allocation5 + $0x48] sm:$0xff]  ;;  %789 = vmatprep.subr.bf16.mxu1 %v788_v16  ;;  %v796_v23 = vpack.c.bf16 %v266_v20, %v265_v19  ;;  %v268_v26 = vld [vmem:[#allocation8 + $0x38] sm:$0xff]  ;;  %v159_v27 = vld [vmem:[#allocation5 + $0x50] sm:$0xff] }
  0xab   :  { %791 = vmatpush3.bf16.msra.mxu1 %v788_v16  ;;  %v772_v24 = vpack.c.bf16 %v158_v22, %v157_v21  ;;  %v160_v28 = vld [vmem:[#allocation5 + $0x58] sm:$0xff]  ;;  %v800_v29 = vpack.c.bf16 %v268_v26, %v267_v25  ;;  %v269_v31 = vld [vmem:[#allocation8 + $0x40] sm:$0xff]  ;;  %v270_v32 = vld [vmem:[#allocation8 + $0x48] sm:$0xff]  ;;  %p1094_p6 = pnand %p1093_p5, %p1087_p2 }
  0xac   :  { %763 = vmatpush3.bf16.msra.mxu0 %v760_v5  ;;  %793 = vmatprep.subr.bf16.mxu1 %v792_v17  ;;  %v776_v30 = vpack.c.bf16 %v160_v28, %v159_v27  ;;  %v161_v33 = vld [vmem:[#allocation5 + $0x60] sm:$0xff]  ;;  %v162_v34 = vld [vmem:[#allocation5 + $0x68] sm:$0xff]  ;;  %v804_v35 = vpack.c.bf16 %v270_v32, %v269_v31  ;;  %v271_v37 = vld [vmem:[#allocation8 + $0x50] sm:$0xff] }
  0xad   :  { %765 = vmatprep.subr.bf16.mxu0 %v764_v8  ;;  %v780_v36 = vpack.c.bf16 %v162_v34, %v161_v33  ;;  %v272_v38 = vld [vmem:[#allocation8 + $0x58] sm:$0xff]  ;;  %v163_v39 = vld [vmem:[#allocation5 + $0x70] sm:$0xff]  ;;  %v273_v43 = vld [vmem:[#allocation8 + $0x60] sm:$0xff] }
  0xae   :  { %v164_v40 = vld [vmem:[#allocation5 + $0x78] sm:$0xff]  ;;  %v808_v41 = vpack.c.bf16 %v272_v38, %v271_v37  ;;  %v274_v44 = vld [vmem:[#allocation8 + $0x68] sm:$0xff]  ;;  %v577_v10 = vld [vmem:[#allocation7] ss:$0 sm:$0xff] }
  0xaf   :  { %795 = vmatpush3.bf16.msra.mxu1 %v792_v17  ;;  %v784_v42 = vpack.c.bf16 %v164_v40, %v163_v39  ;;  %v812_v45 = vpack.c.bf16 %v274_v44, %v273_v43  ;;  %v1312_v46 = vld [vmem:[#allocation2 + $0x8] sm:$0xff]  ;;  %v1314_v47 = vld [vmem:[#allocation2 + $0x10] sm:$0xff]  ;;  %v1318_v48 = vld [vmem:[#allocation2 + $0x18] sm:$0xff] }
  0xb0   :  { %767 = vmatpush3.bf16.msra.mxu0 %v764_v8  ;;  %797 = vmatprep.subr.bf16.mxu1 %v796_v23  ;;  %v275_v49 = vld [vmem:[#allocation8 + $0x70] sm:$0xff]  ;;  %v276_v50 = vld [vmem:[#allocation8 + $0x78] sm:$0xff]  ;;  %v373_v52 = vld [vmem:[#allocation11] sm:$0xff] }
  0xb1   :  { %769 = vmatprep.subr.bf16.mxu0 %v768_v18  ;;  %v816_v51 = vpack.c.bf16 %v276_v50, %v275_v49  ;;  %v374_v53 = vld [vmem:[#allocation11 + $0x8] sm:$0xff]  ;;  %v375_v54 = vld [vmem:[#allocation11 + $0x10] sm:$0xff]  ;;  %v376_v56 = vld [vmem:[#allocation11 + $0x18] sm:$0xff] }
  0xb2   :  { %v820_v55 = vpack.c.bf16 %v374_v53, %v373_v52  ;;  %v824_v57 = vpack.c.bf16 %v376_v56, %v375_v54  ;;  %v377_v58 = vld [vmem:[#allocation11 + $0x20] sm:$0xff]  ;;  %v378_v59 = vld [vmem:[#allocation11 + $0x28] sm:$0xff]  ;;  %v379_v61 = vld [vmem:[#allocation11 + $0x30] sm:$0xff] }
  0xb3   :  { %799 = vmatpush3.bf16.msra.mxu1 %v796_v23  ;;  %v828_v60 = vpack.c.bf16 %v378_v59, %v377_v58  ;;  %v380_v62 = vld [vmem:[#allocation11 + $0x38] sm:$0xff]  ;;  %v381_v0 = vld [vmem:[#allocation11 + $0x40] sm:$0xff]  ;;  %v382_v1 = vld [vmem:[#allocation11 + $0x48] sm:$0xff] }
  0xb4   :  { %771 = vmatpush3.bf16.msra.mxu0 %v768_v18  ;;  %801 = vmatprep.subr.bf16.mxu1 %v800_v29  ;;  %v832_v63 = vpack.c.bf16 %v380_v62, %v379_v61  ;;  %v836_v2 = vpack.c.bf16 %v382_v1, %v381_v0  ;;  %v383_v3 = vld [vmem:[#allocation11 + $0x50] sm:$0xff]  ;;  %v384_v4 = vld [vmem:[#allocation11 + $0x58] sm:$0xff]  ;;  %v385_v6 = vld [vmem:[#allocation11 + $0x60] sm:$0xff] }
  0xb5   :  { %773 = vmatprep.subr.bf16.mxu0 %v772_v24  ;;  %v840_v5 = vpack.c.bf16 %v384_v4, %v383_v3  ;;  %v386_v7 = vld [vmem:[#allocation11 + $0x68] sm:$0xff]  ;;  %v387_v23 = vld [vmem:[#allocation11 + $0x70] sm:$0xff]  ;;  %v578_v26 = vld [vmem:[#allocation10] ss:$0 sm:$0xff] }
  0xb6   :  { %v844_v8 = vpack.c.bf16 %v386_v7, %v385_v6  ;;  %v579_v39 = vld [vmem:[#allocation13] ss:$0 sm:$0xff] }
  0xb7   :  { %803 = vmatpush3.bf16.msra.mxu1 %v800_v29 }
  0xb8   :  { %775 = vmatpush3.bf16.msra.mxu0 %v772_v24  ;;  %805 = vmatprep.subr.bf16.mxu1 %v804_v35  ;;  %v388_v24 = vld [vmem:[#allocation11 + $0x78] sm:$0xff] }
  0xb9   :  { %777 = vmatprep.subr.bf16.mxu0 %v776_v30  ;;  %v848_v25 = vpack.c.bf16 %v388_v24, %v387_v23 }
  0xbb   :  { %807 = vmatpush3.bf16.msra.mxu1 %v804_v35 }
  0xbc   :  { %779 = vmatpush3.bf16.msra.mxu0 %v776_v30  ;;  %809 = vmatprep.subr.bf16.mxu1 %v808_v41 }
  0xbd   :  { %781 = vmatprep.subr.bf16.mxu0 %v780_v36 }
  0xbf   :  { %811 = vmatpush3.bf16.msra.mxu1 %v808_v41 }
  0xc0   :  { %783 = vmatpush3.bf16.msra.mxu0 %v780_v36  ;;  %813 = vmatprep.subr.bf16.mxu1 %v812_v45 }
  0xc1   :  { %785 = vmatprep.subr.bf16.mxu0 %v784_v42 }
  0xc3   :  { %815 = vmatpush3.bf16.msra.mxu1 %v812_v45 }
  0xc4   :  { %787 = vmatpush3.bf16.msra.mxu0 %v784_v42  ;;  %817 = vmatprep.subr.bf16.mxu1 %v816_v51 }
  0xc5   :  { %821 = vmatprep.subr.bf16.mxu0 %v820_v55 }
  0xc7   :  { %675 = vmatmul.mubr.f32.vlgmr.msra.gmra.mrb[0].mxu0 %v1312_v46  ;;  %819 = vmatpush3.bf16.msra.mxu1 %v816_v51 }
  0xc8   :  { %677 = vmatprep.mubr.f32.mxu0 %v1314_v47  ;;  %852 = vmatprep.subr.bf16.mxu1 %v820_v55 }
  0xc9   :  { %823 = vmatpush3.bf16.msra.mxu0 %v820_v55 }
  0xca   :  { %825 = vmatprep.subr.bf16.mxu0 %v824_v57 }
  0xcb   :  { %678 = vmatmul.mubr.f32.gmra.mrb[2].mxu0 %v1318_v48 }
  0xcd   :  { %827 = vmatpush3.bf16.msra.mxu0 %v824_v57 }
  0xce   :  { %829 = vmatprep.subr.bf16.mxu0 %v828_v60 }
  0xd1   :  { %831 = vmatpush3.bf16.msra.mxu0 %v828_v60 }
  0xd2   :  { %833 = vmatprep.subr.bf16.mxu0 %v832_v63 }
  0xd5   :  { %835 = vmatpush3.bf16.msra.mxu0 %v832_v63 }
  0xd6   :  { %837 = vmatprep.subr.bf16.mxu0 %v836_v2 }
  0xd9   :  { %839 = vmatpush3.bf16.msra.mxu0 %v836_v2 }
  0xda   :  { %841 = vmatprep.subr.bf16.mxu0 %v840_v5 }
  0xdd   :  { %843 = vmatpush3.bf16.msra.mxu0 %v840_v5 }
  0xde   :  { %845 = vmatprep.subr.bf16.mxu0 %v844_v8 }
  0xe1   :  { %847 = vmatpush3.bf16.msra.mxu0 %v844_v8 }
  0xe2   :  { %849 = vmatprep.subr.bf16.mxu0 %v848_v25 }
  0xe5   :  { %851 = vmatpush3.bf16.msra.mxu0 %v848_v25 }
 0x19a   :  { %v676_v11 = vpop.f32.mrb[0].mxu0 }
 0x19b   :  { %v244_v12 = vadd.f32 %v676_v11, %v577_v10  ;;  %v238_v13 = vpop.f32.mrb[1].mxu0 }
 0x19c   :  { %v239_v14 = vadd.f32 %v577_v10, %v238_v13 }
 0x19d   :  { %v258_v17 = vmax.f32 %v244_v12, 0.0 }
 0x19e   :  { %v679_v15 = vpop.f32.mrb[2].mxu0  ;;  %v257_v16 = vmax.f32 %v239_v14, 0.0 }
 0x19f   :  { %v254_v18 = vadd.f32 %v679_v15, %v577_v10  ;;  %v248_v19 = vpop.f32.mrb[3].mxu0 }
 0x1a0   :  { %v249_v20 = vadd.f32 %v577_v10, %v248_v19  ;;  %712 = vmatprep.mubr.f32.mxu1 %v257_v16  ;;  %v581_v19 = vld [vmem:[#allocation16] ss:$0 sm:$0xff] }
 0x1a1   :  { %713 = vmatmul.mubr.f32.vlgmr.msra.gmra.mrb[0].mxu1 %v258_v17  ;;  %v260_v22 = vmax.f32 %v254_v18, 0.0  ;;  %v580_v17 = vld [vmem:[#allocation14] ss:$0 sm:$0xff] }
 0x1a2   :  { %v259_v21 = vmax.f32 %v249_v20, 0.0  ;;  %860 = vmatpush3.bf16.msra.mxu1 %v820_v55 }
 0x1a3   :  { %853 = vmatprep.subr.bf16.mxu1 %v824_v57 }
 0x1a4   :  { %715 = vmatprep.mubr.f32.mxu1 %v259_v21 }
 0x1a5   :  { %716 = vmatmul.mubr.f32.gmra.mrb[2].mxu1 %v260_v22 }
 0x1a6   :  { %861 = vmatpush3.bf16.msra.mxu1 %v824_v57 }
 0x1a7   :  { %854 = vmatprep.subr.bf16.mxu1 %v828_v60 }
 0x1aa   :  { %862 = vmatpush3.bf16.msra.mxu1 %v828_v60 }
 0x1ab   :  { %855 = vmatprep.subr.bf16.mxu1 %v832_v63 }
 0x1ae   :  { %863 = vmatpush3.bf16.msra.mxu1 %v832_v63 }
 0x1af   :  { %856 = vmatprep.subr.bf16.mxu1 %v836_v2 }
 0x1b2   :  { %864 = vmatpush3.bf16.msra.mxu1 %v836_v2 }
 0x1b3   :  { %857 = vmatprep.subr.bf16.mxu1 %v840_v5 }
 0x1b6   :  { %865 = vmatpush3.bf16.msra.mxu1 %v840_v5 }
 0x1b7   :  { %858 = vmatprep.subr.bf16.mxu1 %v844_v8 }
 0x1ba   :  { %866 = vmatpush3.bf16.msra.mxu1 %v844_v8 }
 0x1bb   :  { %859 = vmatprep.subr.bf16.mxu1 %v848_v25 }
 0x1be   :  { %867 = vmatpush3.bf16.msra.mxu1 %v848_v25 }
 0x274   :  { %v714_v27 = vpop.f32.mrb[0].mxu1 }
 0x275   :  { %v356_v28 = vadd.f32 %v714_v27, %v578_v26  ;;  %v350_v29 = vpop.f32.mrb[1].mxu1 }
 0x276   :  { %v351_v30 = vadd.f32 %v578_v26, %v350_v29 }
 0x277   :  { %v370_v33 = vmax.f32 %v356_v28, 0.0 }
 0x278   :  { %v369_v31 = vmax.f32 %v351_v30, 0.0  ;;  %v717_v32 = vpop.f32.mrb[2].mxu1 }
 0x279   :  { %v366_v34 = vadd.f32 %v717_v32, %v578_v26  ;;  %v360_v35 = vpop.f32.mrb[3].mxu1 }
 0x27a   :  { %v361_v36 = vadd.f32 %v578_v26, %v360_v35  ;;  %750 = vmatprep.mubr.f32.mxu0 %v369_v31 }
 0x27b   :  { %751 = vmatmul.mubr.f32.vlgmr.msra.gmra.mrb[4].mxu0 %v370_v33  ;;  %v372_v38 = vmax.f32 %v366_v34, 0.0 }
 0x27c   :  { %v371_v37 = vmax.f32 %v361_v36, 0.0 }
 0x27e   :  { %753 = vmatprep.mubr.f32.mxu1 %v371_v37 }
 0x27f   :  { %754 = vmatmul.mubr.f32.vlgmr.msra.gmra.mrb[4].mxu1 %v372_v38 }
 0x34e   :  { %v752_v40 = vpop.f32.mrb[4].mxu0 }
 0x34f   :  { %v462_v41 = vpop.f32.mrb[5].mxu0  ;;  %v468_v43 = vadd.f32 %v752_v40, %v579_v39 }
 0x350   :  { %v463_v42 = vadd.f32 %v579_v39, %v462_v41 }
 0x351   :  { %v482_v53 = vadd.f32 %v468_v43, %v1312_v46 }
 0x352   :  { %v755_v44 = vpop.f32.mrb[4].mxu1  ;;  %v481_v45 = vadd.f32 %v463_v42, %v1309_v9 }
 0x353   :  { %v472_v49 = vpop.f32.mrb[5].mxu1  ;;  %v478_v51 = vadd.f32 %v755_v44, %v579_v39 }
 0x354   :  { %v473_v50 = vadd.f32 %v579_v39, %v472_v49  ;;  %485 = vadd.xlane.f32.xlu0 %v481_v45 }
 0x355   :  { %v484_v54 = vadd.f32 %v478_v51, %v1318_v48 }
 0x356   :  { %v483_v52 = vadd.f32 %v473_v50, %v1314_v47 }
 0x358   :  { %489 = vadd.xlane.f32.xlu1 %v483_v52  ;;  %487 = vadd.xlane.f32.xlu0 %v482_v53 }
 0x35c   :  { %491 = vadd.xlane.f32.xlu1 %v484_v54 }
 0x3e1   :  { %v486_v55 = vpop.xlane.xlu0 %485 }
 0x3e2   :  { %v494_v56 = vmul.f32 0.0078125, %v486_v55 }
 0x3e4   :  { %v498_v57 = vsub.f32 %v481_v45, %v494_v56 }
 0x3e5   :  { %v490_v58 = vpop.xlane.xlu1 %489  ;;  %v488_v59 = vpop.xlane.xlu0 %487 }
 0x3e6   :  { %v496_v60 = vmul.f32 0.0078125, %v490_v58  ;;  %v495_v9 = vmul.f32 0.0078125, %v488_v59  ;;  %v502_v61 = vmul.f32 %v498_v57, %v498_v57 }
 0x3e8   :  { %v500_v62 = vsub.f32 %v483_v52, %v496_v60  ;;  %v499_v63 = vsub.f32 %v482_v53, %v495_v9  ;;  %506 = vadd.xlane.f32.xlu0 %v502_v61 }
 0x3e9   :  { %v492_v0 = vpop.xlane.xlu1 %491 }
 0x3ea   :  { %v497_v47 = vmul.f32 0.0078125, %v492_v0  ;;  %v504_v1 = vmul.f32 %v500_v62, %v500_v62  ;;  %v503_v46 = vmul.f32 %v499_v63, %v499_v63 }
 0x3ec   :  { %v501_v2 = vsub.f32 %v484_v54, %v497_v47  ;;  %510 = vadd.xlane.f32.xlu0 %v504_v1  ;;  %508 = vadd.xlane.f32.xlu1 %v503_v46 }
 0x3ee   :  { %v505_v48 = vmul.f32 %v501_v2, %v501_v2 }
 0x3f0   :  { %512 = vadd.xlane.f32.xlu1 %v505_v48 }
 0x475   :  { %v507_v3 = vpop.xlane.xlu0 %506 }
 0x476   :  { %v514_v4 = vmul.f32 0.0078125, %v507_v3 }
 0x478   :  { %v518_v5 = vadd.f32 1e-05, %v514_v4 }
 0x479   :  { %v509_v6 = vpop.xlane.xlu1 %508  ;;  %v511_v7 = vpop.xlane.xlu0 %510 }
 0x47a   :  { %880 = vrsqrt.f32 %v518_v5  ;;  %v515_v8 = vmul.f32 0.0078125, %v509_v6  ;;  %v516_v10 = vmul.f32 0.0078125, %v511_v7 }
 0x47c   :  { %v519_v11 = vadd.f32 1e-05, %v515_v8  ;;  %v520_v12 = vadd.f32 1e-05, %v516_v10 }
 0x47d   :  { %v513_v13 = vpop.xlane.xlu1 %512 }
 0x47e   :  { %882 = vrsqrt.f32 %v519_v11  ;;  %v517_v14 = vmul.f32 0.0078125, %v513_v13 }
 0x47f   :  { %884 = vrsqrt.f32 %v520_v12 }
 0x480   :  { %v521_v15 = vadd.f32 1e-05, %v517_v14 }
 0x482   :  { %886 = vrsqrt.f32 %v521_v15 }
 0x484   :  { %v881_v16 = vpop.eup %880 }
 0x485   :  { %v526_v18 = vmul.f32 %v881_v16, %v498_v57 }
 0x487   :  { %v537_v20 = vmul.f32 %v580_v17, %v526_v18 }
 0x488   :  { %v883_v21 = vpop.eup %882 }
 0x489   :  { %v885_v22 = vpop.eup %884  ;;  %v527_v23 = vmul.f32 %v883_v21, %v499_v63  ;;  %v548_v24 = vadd.f32 %v581_v19, %v537_v20 }
 0x48a   :  { %v528_v25 = vmul.f32 %v885_v22, %v500_v62 }
 0x48b   :  { %v538_v26 = vmul.f32 %v580_v17, %v527_v23  ;;  %552 = vst [vmem:[#allocation17] sm:$0xff] %v548_v24 }
 0x48c   :  { %v887_v27 = vpop.eup %886  ;;  %v539_v28 = vmul.f32 %v580_v17, %v528_v25 }
 0x48d   :  { %v529_v29 = vmul.f32 %v887_v27, %v501_v2  ;;  %v549_v30 = vadd.f32 %v581_v19, %v538_v26 }
 0x48e   :  { %v550_v31 = vadd.f32 %v581_v19, %v539_v28 }
 0x48f   :  { %v540_v32 = vmul.f32 %v580_v17, %v529_v29  ;;  %553 = vst [vmem:[#allocation17 + $0x8] sm:$0xff] %v549_v30 }
 0x490   :  { %554 = vst [vmem:[#allocation17 + $0x10] sm:$0xff] %v550_v31 }
 0x491   :  { %v551_v33 = vadd.f32 %v581_v19, %v540_v32 }
 0x493   :  { %555 = vst [vmem:[#allocation17 + $0x18] sm:$0xff] %v551_v33 }
 0x494   :  { %1097 = shalt.err (!%p1094_p6)
}
 0x495   :  { %s1098_s13 = scalar_lea.hbm %s1349_s9, 512 }
 0x496   :  { %p1099_p7 = scmp.ne.s32.totalorder %s1349_s9, %s1098_s13  ;;  %p1102_p8 = scmp.lt.u32.totalorder %s1098_s13, %s1349_s9 }
 0x498   :  { %p1104_p9 = pnand %p1102_p8, %p1099_p7 }
 0x49a   :  { %1107 = shalt.err (!%p1104_p9)
}
 0x49b   :  { %567 = dma.vmem_to_hbm [thread:$0]  %s562_s23, 512, %s1349_s9, [#allocation4], %s1122_s21, %s1122_s21, %s1123_s22  }
 0x49c   :  { %1118 = dma.done.wait [#allocation4], 512  }
 0x49d   :  { %1119 = vsyncadd [#allocation4], 4294966784 }
 0x49e   :  { %571 = vsyncpa [#allocation3], 1 }
 0x49f   :  { %572 = vsyncpa [#allocation6], 1 }
 0x4a0   :  { %573 = vsyncpa [#allocation9], 1 }
 0x4a1   :  { %574 = vsyncpa [#allocation12], 1 }
 0x4a2   :  { %575 = vsyncpa [#allocation15], 1 }
 0x4a3   :  { %576 = vsyncpa [#allocation4], 1 }

</bundles_post_ra>
